<compile_context>
chip_gen: v6e
topology: v6e:2x2x1
jax: 0.10.0
libtpu: 0.0.40
codegen_flags: <defaults>
</compile_context>

<pallas_src>
import math
import jax
import jax.numpy as jnp
from jax.experimental import pallas as pl
from jax.experimental.pallas import tpu as pltpu


def _round_up(x, m):
    return ((x + m - 1) // m) * m


def timestep_embedder_kernel(t_ref, freqs_ref, w1_ref, b1_ref, w2_ref, b2_ref,
                             out_ref):
    # t_ref:     (TN, 1)      f32   scalar timesteps (one tile of the batch)
    # freqs_ref: (1, half)    f32   exp(-log(max_period) * k / half)
    # w1_ref:    (fe, H)      bf16  first Linear weight (transposed, [cos|sin] rows)
    # b1_ref:    (1, H)       f32
    # w2_ref:    (H, H)       bf16  second Linear weight (transposed)
    # b2_ref:    (1, H)       f32
    # out_ref:   (TN, H)      out_dtype
    t = t_ref[...]                        # (TN, 1)  f32
    # Keep args/cos/sin in f32: args can reach ~max_period for low-k freqs and
    # bf16's mantissa would destroy the phase.
    args = t * freqs_ref[...]             # (TN, half) f32 (VPU broadcast)

    # cos/sin on the EUP in f32; results are bounded in [-1, 1] so narrow them
    # to bf16 immediately (halves live-vreg / spill footprint at large tiles).
    cos_e = jnp.cos(args).astype(jnp.bfloat16)
    sin_e = jnp.sin(args).astype(jnp.bfloat16)

    # Lane-axis concat of two 128-lane-aligned halves: pure vreg placement,
    # no XLU shuffle. Gives a single K=fe matmul (matches 256-deep MXU).
    emb = jnp.concatenate([cos_e, sin_e], axis=-1)      # (TN, fe) bf16

    # Layer 1: one bf16 MXU matmul, f32 accumulate, f32 bias.
    h = jnp.dot(emb, w1_ref[...],
                preferred_element_type=jnp.float32) + b1_ref[...]

    # SiLU: h * sigmoid(h), with sigmoid = 1 / (1 + exp(-h)).
    # exp on the EUP, approx vrcp for the divide (cheap, separate slot).
    h = h * pl.reciprocal(1.0 + jnp.exp(-h), approx=True)

    # Layer 2: bf16 MXU matmul, f32 accumulate, bias, cast to output dtype.
    out = jnp.dot(h.astype(jnp.bfloat16), w2_ref[...],
                  preferred_element_type=jnp.float32) + b2_ref[...]
    out_ref[...] = out.astype(out_ref.dtype)


def timestep_embedder(t, params, frequency_embedding_size=256,
                      max_period=10000, tile_n=1024, out_dtype=jnp.bfloat16):
    """t: (N,) array of timesteps. Returns (N, hidden_size) in out_dtype."""
    w1, b1, w2, b2 = params
    fe = frequency_embedding_size
    half = fe // 2
    hidden = w1.shape[1]
    n = t.shape[0]

    # TODO(synk): fe % 2 == 1 zero-pad branch of timestep_embedding not needed
    # for the default fe=256; omitted.

    # Matmul weights as bf16 (MXU-native, halves weight HBM traffic); biases f32.
    w1b = w1.astype(jnp.bfloat16)                      # (fe, H)
    w2b = w2.astype(jnp.bfloat16)                      # (H, H)
    b1r = b1.reshape(1, hidden).astype(jnp.float32)
    b2r = b2.reshape(1, hidden).astype(jnp.float32)

    # Constant frequency table (parameter-like glue, computed once in JAX).
    freqs = jnp.exp(
        -math.log(max_period) * jnp.arange(half, dtype=jnp.float32) / half
    ).reshape(1, half)

    # Batch tile: 16-row aligned (bf16 sublane packing), capped at tile_n, and
    # also capped so large N yields >= ~4 grid steps (both v7x TCs get work).
    # No padding: grid = cdiv(n, tn); the last block may be partial — Pallas
    # masks out-of-bounds writeback, so no post-call slice/copy is needed.
    tn = max(16, min(tile_n, _round_up(pl.cdiv(n, 4), 16)))
    grid = (pl.cdiv(n, tn),)

    t2d = t.astype(jnp.float32).reshape(n, 1)

    # Advisory cost estimate so XLA can overlap the weight fetch.
    out_bytes = jnp.dtype(out_dtype).itemsize
    flops = 2 * n * (fe * hidden + hidden * hidden)
    transcendentals = n * (fe + hidden)               # cos + sin + exp
    bytes_accessed = (
        t2d.size * 4 + n * hidden * out_bytes         # t in, out
        + (w1b.size + w2b.size) * 2                   # bf16 weights
        + (b1r.size + b2r.size + freqs.size) * 4      # f32 residents
    )

    # TODO(synk): for very large hidden_size (>=4096) on v7x, the resident w2
    # block is double-buffered by default; use pipeline_mode=pl.Buffered(1) on
    # the constant-index weight specs (or tile the hidden axis) to stay in VMEM.
    return pl.pallas_call(
        timestep_embedder_kernel,
        out_shape=jax.ShapeDtypeStruct((n, hidden), out_dtype),
        grid_spec=pltpu.PrefetchScalarGridSpec(
            num_scalar_prefetch=0,
            grid=grid,
            in_specs=[
                pl.BlockSpec((tn, 1), lambda i: (i, 0)),          # t tile
                pl.BlockSpec((1, half), lambda i: (0, 0)),        # freqs (resident)
                pl.BlockSpec((fe, hidden), lambda i: (0, 0)),     # w1 (resident)
                pl.BlockSpec((1, hidden), lambda i: (0, 0)),      # b1 (resident)
                pl.BlockSpec((hidden, hidden), lambda i: (0, 0)), # w2 (resident)
                pl.BlockSpec((1, hidden), lambda i: (0, 0)),      # b2 (resident)
            ],
            out_specs=pl.BlockSpec((tn, hidden), lambda i: (i, 0)),
        ),
        compiler_params=pltpu.CompilerParams(
            dimension_semantics=("parallel",),        # shard batch over v7x TCs
        ),
        cost_estimate=pl.CostEstimate(
            flops=flops,
            transcendentals=transcendentals,
            bytes_accessed=bytes_accessed,
        ),
    )(t2d, freqs, w1b, b1r, w2b, b2r)


def init_params(key, hidden_size, frequency_embedding_size=256):
    """Deterministic synthetic params. Weights stored as (in, out), f32."""
    k1, k2, k3, k4 = jax.random.split(key, 4)
    fe = frequency_embedding_size
    w1 = jax.random.normal(k1, (fe, hidden_size), jnp.float32) * (1.0 / math.sqrt(fe))
    b1 = jax.random.normal(k2, (hidden_size,), jnp.float32) * 0.01
    w2 = jax.random.normal(k3, (hidden_size, hidden_size), jnp.float32) * (
        1.0 / math.sqrt(hidden_size)
    )
    b2 = jax.random.normal(k4, (hidden_size,), jnp.float32) * 0.01
    return w1, b1, w2, b2


def reference(t, params, frequency_embedding_size=256, max_period=10000):
    """Pure-JAX f32 reference mirroring the PyTorch forward."""
    w1, b1, w2, b2 = params
    half = frequency_embedding_size // 2
    freqs = jnp.exp(-math.log(max_period) * jnp.arange(half, dtype=jnp.float32) / half)
    args = t.astype(jnp.float32)[:, None] * freqs[None]
    emb = jnp.concatenate([jnp.cos(args), jnp.sin(args)], axis=-1)
    h = emb @ w1 + b1
    h = h * jax.nn.sigmoid(h)
    return h @ w2 + b2


if __name__ == "__main__":
    HIDDEN = 128             # hidden_size
    FE = 256                 # frequency_embedding_size (module default)

    key = jax.random.PRNGKey(0)
    kp, kt = jax.random.split(key)
    params = init_params(kp, HIDDEN, FE)

    # N=20 with tn=16 -> 2 grid steps; last block partial (4 valid rows,
    # masked writeback) — exercises the no-padding / no-slice path.
    N = 20
    t = jax.random.uniform(kt, (N,), jnp.float32, minval=0.0, maxval=1000.0)
    ref = reference(t, params, FE)

    # Default (bf16 output) path.
    out = jax.block_until_ready(timestep_embedder(t, params, FE))
    assert out.shape == (N, HIDDEN), out.shape
    assert out.dtype == jnp.bfloat16, out.dtype
    assert jnp.allclose(out.astype(jnp.float32), ref, atol=1e-1, rtol=5e-2), float(
        jnp.max(jnp.abs(out.astype(jnp.float32) - ref))
    )

    # f32-output path, tighter tolerance (bf16 matmul operands, f32 accum).
    out32 = jax.block_until_ready(
        timestep_embedder(t, params, FE, out_dtype=jnp.float32)
    )
    assert out32.dtype == jnp.float32
    assert jnp.allclose(out32, ref, atol=5e-2, rtol=5e-2), float(
        jnp.max(jnp.abs(out32 - ref))
    )

    # Single full tile (grid=1, no partial block).
    t16 = t[:16]
    out16 = jax.block_until_ready(timestep_embedder(t16, params, FE))
    assert jnp.allclose(out16.astype(jnp.float32), reference(t16, params, FE),
                        atol=1e-1, rtol=5e-2)

    print("KERNEL_OK")
</pallas_src>

<mosaic_0001>
module attributes {stable_mosaic.version = 11 : i64} {
  func.func @timestep_embedder_kernel(%arg0: i32, %arg1: memref<16x1xf32, #tpu.memory_space<vmem>>, %arg2: memref<1x128xf32, #tpu.memory_space<vmem>>, %arg3: memref<256x128xbf16, #tpu.memory_space<vmem>>, %arg4: memref<1x128xf32, #tpu.memory_space<vmem>>, %arg5: memref<128x128xbf16, #tpu.memory_space<vmem>>, %arg6: memref<1x128xf32, #tpu.memory_space<vmem>>, %arg7: memref<16x128xbf16, #tpu.memory_space<vmem>>) attributes {dimension_semantics = [#tpu.dimension_semantics<parallel>], iteration_bounds = array<i64: 2>, scalar_prefetch = 0 : i64, scratch_operands = 0 : i64, tpu.core_type = #tpu.core_type<tc>, window_params = [{transform_indices = @transform_0, window_bounds = array<i64: 16, 1>}, {pipeline_mode = #tpu.pipeline_mode<synchronous>, transform_indices = @transform_1, window_bounds = array<i64: 1, 128>}, {pipeline_mode = #tpu.pipeline_mode<synchronous>, transform_indices = @transform_2, window_bounds = array<i64: 256, 128>}, {pipeline_mode = #tpu.pipeline_mode<synchronous>, transform_indices = @transform_3, window_bounds = array<i64: 1, 128>}, {pipeline_mode = #tpu.pipeline_mode<synchronous>, transform_indices = @transform_4, window_bounds = array<i64: 128, 128>}, {pipeline_mode = #tpu.pipeline_mode<synchronous>, transform_indices = @transform_5, window_bounds = array<i64: 1, 128>}, {transform_indices = @transform_6, window_bounds = array<i64: 16, 128>}]} {
    %c0 = arith.constant 0 : index
    %c0_0 = arith.constant 0 : index
    %0 = vector.load %arg1[%c0, %c0_0] : memref<16x1xf32, #tpu.memory_space<vmem>>, vector<16x1xf32>
    %c0_1 = arith.constant 0 : index
    %c0_2 = arith.constant 0 : index
    %1 = vector.load %arg2[%c0_1, %c0_2] : memref<1x128xf32, #tpu.memory_space<vmem>>, vector<1x128xf32>
    %2 = vector.broadcast %0 : vector<16x1xf32> to vector<16x128xf32>
    %3 = vector.broadcast %1 : vector<1x128xf32> to vector<16x128xf32>
    %4 = arith.mulf %2, %3 : vector<16x128xf32>
    %5 = math.cos %4 : vector<16x128xf32>
    %6 = arith.truncf %5 : vector<16x128xf32> to vector<16x128xbf16>
    %7 = math.sin %4 : vector<16x128xf32>
    %8 = arith.truncf %7 : vector<16x128xf32> to vector<16x128xbf16>
    %9 = tpu.concatenate %6, %8 in 1 : vector<16x128xbf16>, vector<16x128xbf16> -> vector<16x256xbf16>
    %c0_3 = arith.constant 0 : index
    %c0_4 = arith.constant 0 : index
    %10 = vector.load %arg3[%c0_3, %c0_4] : memref<256x128xbf16, #tpu.memory_space<vmem>>, vector<256x128xbf16>
    %cst = arith.constant dense<0.000000e+00> : vector<16x128xf32>
    %11 = tpu.matmul %9, %10, %cst {dimension_numbers = #tpu.dot_dimension_numbers<[1], [0], [0], [1], [0, 0, 1, 1], [], []>} : vector<16x256xbf16>, vector<256x128xbf16>, vector<16x128xf32> -> vector<16x128xf32>
    %c0_5 = arith.constant 0 : index
    %c0_6 = arith.constant 0 : index
    %12 = vector.load %arg4[%c0_5, %c0_6] : memref<1x128xf32, #tpu.memory_space<vmem>>, vector<1x128xf32>
    %13 = vector.broadcast %12 : vector<1x128xf32> to vector<16x128xf32>
    %14 = arith.addf %11, %13 : vector<16x128xf32>
    %cst_7 = arith.constant 0.000000e+00 : f32
    %15 = vector.broadcast %cst_7 : f32 to vector<16x128xf32>
    %16 = arith.subf %15, %14 : vector<16x128xf32>
    %17 = math.exp %16 : vector<16x128xf32>
    %cst_8 = arith.constant 1.000000e+00 : f32
    %18 = vector.broadcast %cst_8 : f32 to vector<16x128xf32>
    %19 = arith.addf %18, %17 : vector<16x128xf32>
    %20 = tpu.reciprocal %19 {approx = true} : vector<16x128xf32> -> vector<16x128xf32>
    %21 = arith.mulf %14, %20 : vector<16x128xf32>
    %22 = arith.truncf %21 : vector<16x128xf32> to vector<16x128xbf16>
    %c0_9 = arith.constant 0 : index
    %c0_10 = arith.constant 0 : index
    %23 = vector.load %arg5[%c0_9, %c0_10] : memref<128x128xbf16, #tpu.memory_space<vmem>>, vector<128x128xbf16>
    %cst_11 = arith.constant dense<0.000000e+00> : vector<16x128xf32>
    %24 = tpu.matmul %22, %23, %cst_11 {dimension_numbers = #tpu.dot_dimension_numbers<[1], [0], [0], [1], [0, 0, 1, 1], [], []>} : vector<16x128xbf16>, vector<128x128xbf16>, vector<16x128xf32> -> vector<16x128xf32>
    %c0_12 = arith.constant 0 : index
    %c0_13 = arith.constant 0 : index
    %25 = vector.load %arg6[%c0_12, %c0_13] : memref<1x128xf32, #tpu.memory_space<vmem>>, vector<1x128xf32>
    %26 = vector.broadcast %25 : vector<1x128xf32> to vector<16x128xf32>
    %27 = arith.addf %24, %26 : vector<16x128xf32>
    %28 = arith.truncf %27 : vector<16x128xf32> to vector<16x128xbf16>
    %c0_14 = arith.constant 0 : index
    %c0_15 = arith.constant 0 : index
    %29 = vector.load %arg7[%c0_14, %c0_15] : memref<16x128xbf16, #tpu.memory_space<vmem>>, vector<16x128xbf16>
    tpu.vector_store %arg7[%c0_14, %c0_15], %28 {strides = array<i32>} : memref<16x128xbf16, #tpu.memory_space<vmem>>, vector<16x128xbf16>,
    return
  }
  func.func @transform_0(%arg0: i32) -> (i32, i32) {
    %c0_i32 = arith.constant 0 : i32
    %c0_i32_0 = arith.constant 0 : i32
    return %arg0, %c0_i32 : i32, i32
  }
  func.func @transform_1(%arg0: i32) -> (i32, i32) {
    %c0_i32 = arith.constant 0 : i32
    %c0_i32_0 = arith.constant 0 : i32
    %c0_i32_1 = arith.constant 0 : i32
    return %c0_i32, %c0_i32_0 : i32, i32
  }
  func.func @transform_2(%arg0: i32) -> (i32, i32) {
    %c0_i32 = arith.constant 0 : i32
    %c0_i32_0 = arith.constant 0 : i32
    %c0_i32_1 = arith.constant 0 : i32
    return %c0_i32, %c0_i32_0 : i32, i32
  }
  func.func @transform_3(%arg0: i32) -> (i32, i32) {
    %c0_i32 = arith.constant 0 : i32
    %c0_i32_0 = arith.constant 0 : i32
    %c0_i32_1 = arith.constant 0 : i32
    return %c0_i32, %c0_i32_0 : i32, i32
  }
  func.func @transform_4(%arg0: i32) -> (i32, i32) {
    %c0_i32 = arith.constant 0 : i32
    %c0_i32_0 = arith.constant 0 : i32
    %c0_i32_1 = arith.constant 0 : i32
    return %c0_i32, %c0_i32_0 : i32, i32
  }
  func.func @transform_5(%arg0: i32) -> (i32, i32) {
    %c0_i32 = arith.constant 0 : i32
    %c0_i32_0 = arith.constant 0 : i32
    %c0_i32_1 = arith.constant 0 : i32
    return %c0_i32, %c0_i32_0 : i32, i32
  }
  func.func @transform_6(%arg0: i32) -> (i32, i32) {
    %c0_i32 = arith.constant 0 : i32
    %c0_i32_0 = arith.constant 0 : i32
    return %arg0, %c0_i32 : i32, i32
  }
}

</mosaic_0001>

<bundles_post_ra>
// kernel: tpu_custom_call.1
= control target key start
LH: loop header
LB: loop body
LE: loop exit
PB: predicated region body
PF: predicated region fallthrough
CT: control target
= control target key end

     0   :  { %11 = vsyncpa [#allocation3], 0  ;;  %s1821_s0 = inlined_call_operand.vmem [shape: f32[20,1], index: 0, kind: input, shape index: {}]   ;;  %s1822_s1 = inlined_call_operand.vmem [shape: f32[1,128], index: 1, kind: input, shape index: {}]   ;;  %s1823_s2 = inlined_call_operand.hbm [shape: bf16[256,128], index: 2, kind: input, shape index: {}]   ;;  %s1824_s3 = inlined_call_operand.vmem [shape: f32[1,128], index: 3, kind: input, shape index: {}]   ;;  %s1825_s4 = inlined_call_operand.hbm [shape: bf16[128,128], index: 4, kind: input, shape index: {}]   ;;  %s1826_s5 = inlined_call_operand.vmem [shape: f32[1,128], index: 5, kind: input, shape index: {}]   ;;  %s1827_s6 = inlined_call_operand.hbm [shape: bf16[20,128], index: 6, kind: output, shape index: {}]  }
   0x1   :  { %12 = vsyncpa [#allocation6], 0 }
   0x2   :  { %13 = vsyncpa [#allocation4], 0 }
   0x3   :  { %15 = vsyncpa [#allocation4 + $0x1], 0  ;;  %s1578_s21 = smov 0   ;;  %s1580_s22 = smov 0  }
   0x4   :  { %s1582_s23 = smov 0   ;;  %s1584_s24 = smov 0  }
   0x5 LB: > { %s1599_s25 = sadd.s32 4294967295, %s1525_s24   ;;  %s1160_s26 = sadd.s32 4294967294, %s1525_s24   ;;  %s1525_s24 = sphi %s1584_s24, %s1843_s24   ;;  %s1521_s23 = sphi %s1582_s23, %s1842_s23   ;;  %s1517_s22 = sphi %s1580_s22, %s1841_s22   ;;  %s1513_s21 = sphi %s1578_s21, %s1840_s21  }
   0x6   : > { %s1603_s27 = sadd.s32 1, %s1525_s24   ;;  %s159_s28 = sadd.s32 1, %s1521_s23 }
   0x7   : > { %s156_s29 = ssub.s32 %s1525_s24, %s1603_s27  ;;  %p169_p0 = scmp.ne.s32.totalorder %s1521_s23, %s1517_s22 }
   0x8   : > { %p157_p1 = scmp.eq.s32.totalorder %s156_s29, 0  ;;  %p170_p2 = scmp.eq.s32.totalorder %s1599_s25, 1 }
   0x9   : > { %p175_p3 = scmp.ne.s32.totalorder %s1517_s22, %s1513_s21  ;;  %p176_p4 = scmp.eq.s32.totalorder %s1160_s26, 1 }
   0xa   : > { %s1614_s30 = scalar_select %p157_p1, %s1521_s23, %s159_s28  }
   0xb   : > { %p1616_p5 = por %p170_p2, %p169_p0  ;;  %p1620_p6 = por %p176_p4, %p175_p3 }
   0xc   : > { %p1161_p7 = scmp.ge.s32.totalorder %s1525_s24, 1  ;;  %p183_p8 = scmp.lt.s32.totalorder %s1525_s24, 3 }
   0xd   : > { %s1830_s8 = scalar_select %p1620_p6, 1, 0 }
   0xe   : > { %p1828_p9 = scmp.eq.s32.totalorder %s1599_s25, 0  ;;  %p1627_p10 = pnand %p1161_p7, %p183_p8 }
   0xf   : > { %s1527_s10 = smov [#allocation2]   ;;  %s1528_s13 = smov [#allocation5]  }
  0x10   : > { %s198_s11 = sshll.u32 %s1527_s10, 4  ;;  %p1301_p11 = pneg %p1627_p10  ;;  %s199_s11 = int_to_ptr.vmem [resolvable:$true] %s198_s11 }
  0x11   : > { %s214_s14 = sshll.u32 %s1528_s13, 4  ;;  %s1416_s15 = scalar_lea.vmem %s199_s11, 2048  ;;  %s215_s14 = int_to_ptr.vmem [resolvable:$true] %s214_s14 }
  0x12   : > { %p1635_p12 = pnand %p1828_p9, %p1301_p11  ;;  %p1417_p0 = scmp.ne.s32.totalorder %s199_s11, %s1416_s15 }
  0x13   : > { %p1424_p3 = scmp.lt.s32.totalorder %s199_s11, %s199_s11  ;;  %p1425_p4 = scmp.lt.s32.totalorder %s1416_s15, %s1416_s15 }
  0x14   : > { %p1407_p13 = pneg %p1635_p12 }
  0x15   : > { %p1426_p7 = por %p1425_p4, %p1424_p3 }
  0x16   : > { %p1419_p1 = pnand %p1417_p0, %p1407_p13 }
  0x18   : > { %p1420_p2 = pneg %p1419_p1 }
  0x1a   : > { %p1427_p8 = pnand %p1426_p7, %p1420_p2 }
  0x1c   : > { %1430 = shalt.err (!%p1427_p8)
}
  0x1d   : > { %s1529_s16 = smov 64   ;;  %s1530_s17 = smov 4  }
  0x1e   : > { %1304 = dma.hbm_to_vmem [thread:$0]  (!%p1635_p12), %s1823_s2, 2048, %s199_s11, [#allocation3], %s1529_s16, %s1529_s16, %s1530_s17  }
  0x1f   : > { %s1442_s20 = scalar_lea.vmem %s215_s14, 1024  ;;  %p1450_p9 = scmp.lt.s32.totalorder %s215_s14, %s215_s14 }
  0x20   : > { %p1443_p11 = scmp.ne.s32.totalorder %s215_s14, %s1442_s20  ;;  %p1451_p6 = scmp.lt.s32.totalorder %s1442_s20, %s1442_s20 }
  0x22   : > { %p1445_p0 = pnand %p1443_p11, %p1407_p13  ;;  %p1452_p3 = por %p1451_p6, %p1450_p9 }
  0x24   : > { %p1446_p1 = pneg %p1445_p0 }
  0x26   : > { %p1453_p2 = pnand %p1452_p3, %p1446_p1 }
  0x28   : > { %1456 = shalt.err (!%p1453_p2)
}
  0x29   : > { %1307 = dma.hbm_to_vmem [thread:$0]  (!%p1635_p12), %s1825_s4, 1024, %s215_s14, [#allocation6], %s1529_s16, %s1529_s16, %s1530_s17  }
  0x2a   : > { %250 = sbr.rel (%p1627_p10) target bundleno = 751 (0x2ef), region = 44  ;;  %p1833_p4 = scmp.eq.s32.totalorder (!%p1627_p10), %s1599_s25, 0 }
  0x2f   : > { %1500 = dma.done.wait (%p1833_p4), [#allocation3], 2048   ;;  %p1834_p13 = pmov %p1833_p4 }
  0x30   : > { %p1835_p7 = pmov %p1833_p4 }
  0x31   : > { %1502 = vsyncadd (%p1834_p13), [#allocation3], 4294965248 }
  0x32   : > { %1504 = dma.done.wait (%p1835_p7), [#allocation6], 1024   ;;  %p1836_p6 = pmov %p1833_p4 }
  0x33   : > { %s1668_s29 = sshll.u32 %s1599_s25, 1  ;;  %v1531_v0 = vmov 0   ;;  %v1365_v3 = vld [vmem:[#allocation2 + $0x78] sm:$0xff]   ;;  %v1367_v5 = vld [vmem:[#allocation2 + $0x70] sm:$0xff]   ;;  %v1369_v7 = vld [vmem:[#allocation2 + $0x68] sm:$0xff]   ;;  %s285_s18 = sand.u32 1, %s1517_s22  }
  0x34   : > { %1506 = vsyncadd (%p1836_p6), [#allocation6], 4294966272  ;;  %1364 = vset.pattern.permute.xlu0 %v1531_v0  ;;  %p293_p9 = scmp.lt.s32.totalorder %s1668_s29, 2  ;;  %v1366_v4 = vld [vmem:[#allocation2 + $0x38] sm:$0xff]   ;;  %1233 = vmatprep.subr.bf16.mxu0 %v1365_v3  ;;  %v1368_v6 = vld [vmem:[#allocation2 + $0x30] sm:$0xff]   ;;  %s1168_s26 = sshll.u32 %s285_s18, 3 }
  0x35   : > { %1234 = vmatpush3.bf16.msra.mxu0 %v1366_v4  ;;  %v1370_v8 = vld [vmem:[#allocation2 + $0x28] sm:$0xff]   ;;  %v1371_v9 = vld [vmem:[#allocation2 + $0x60] sm:$0xff]   ;;  %v1373_v11 = vld [vmem:[#allocation2 + $0x58] sm:$0xff]   ;;  %v1532_v40 = vmov 683565275   ;;  %s287_s28 = scalar_lea.vmem [#allocation7], %s1168_s26 }
  0x36   : > { %s294_s9 = scalar_select %p293_p9, %s1668_s29, 2  ;;  %1235 = vmatprep.subr.bf16.mxu0 %v1367_v5  ;;  %v1372_v10 = vld [vmem:[#allocation2 + $0x20] sm:$0xff]   ;;  %v1374_v12 = vld [vmem:[#allocation2 + $0x18] sm:$0xff]   ;;  %v1375_v13 = vld [vmem:[#allocation2 + $0x50] sm:$0xff]   ;;  %v1533_v44 = vmov 2475754826  }
  0x37   : > { %v1376_v14 = vld [vmem:[#allocation2 + $0x10] sm:$0xff]   ;;  %v1377_v15 = vld [vmem:[#allocation2 + $0x48] sm:$0xff]   ;;  %v1379_v17 = vld [vmem:[#allocation2 + $0x40] sm:$0xff]   ;;  %v1534_v46 = vmov 2131351028  }
  0x38   : > { %s1170_s10 = sshll.u32 %s294_s9, 3  ;;  %v1378_v16 = vld [vmem:[#allocation2 + $0x8] sm:$0xff]   ;;  %v1380_v18 = vld [vmem:[#allocation2] sm:$0xff]   ;;  %v1535_v48 = vmov 2102212464   ;;  %s1762_s9 = scalar_lea.sflag [#allocation4], %s285_s18 }
  0x39   : > { %s296_s13 = scalar_lea.vmem %s1821_s0, %s1170_s10  ;;  %1236 = vmatpush3.bf16.msra.mxu0 %v1368_v6  ;;  %v1171_v19 = vld [vmem:[%s1822_s1] ss:$0 sm:$0xff]  ;;  %v1536_v50 = vmov 920167782   ;;  %v1537_v57 = vmov 1326507024  }
  0x3a   : > { %v308_v1 = vld [vmem:[%s296_s13] sm:$0xff]  ;;  %v309_v2 = vld [vmem:[%s296_s13 + $0x8] sm:$0xff]  ;;  %1237 = vmatprep.subr.bf16.mxu0 %v1369_v7  ;;  %s1065_s10 = ssub.s32 (%p1616_p5), 3, %s1668_s29 }
  0x3b   : > { %313 = vperm.xlu0 %1364, %v308_v1   ;;  %p1066_p10 = scmp.lt.s32.totalorder (%p1616_p5), %s1065_s10, 2 }
  0x3d   : > { %1238 = vmatpush3.bf16.msra.mxu0 %v1370_v8 }
  0x3e   : > { %1239 = vmatprep.subr.bf16.mxu0 %v1371_v9 }
  0x3f   : > { %318 = vperm.xlu0 %1364, %v309_v2  }
  0x41   : > { %1240 = vmatpush3.bf16.msra.mxu0 %v1372_v10 }
  0x42   : > { %1241 = vmatprep.subr.bf16.mxu0 %v1373_v11 }
  0x45   : > { %1242 = vmatpush3.bf16.msra.mxu0 %v1374_v12 }
  0x46   : > { %1243 = vmatprep.subr.bf16.mxu0 %v1375_v13 }
  0x49   : > { %1244 = vmatpush3.bf16.msra.mxu0 %v1376_v14 }
  0x4a   : > { %1245 = vmatprep.subr.bf16.mxu0 %v1377_v15 }
  0x4d   : > { %1246 = vmatpush3.bf16.msra.mxu0 %v1378_v16 }
  0x4e   : > { %1247 = vmatprep.subr.bf16.mxu0 %v1379_v17 }
  0x51   : > { %1248 = vmatpush3.bf16.msra.mxu0 %v1380_v18 }
  0xb6   : > { %v314_v20 = vpop.permute.xlu0 %313 }
  0xb7   : > { %v1678_v21 = vmul.f32 %v1171_v19, %v314_v20 }
  0xb9   : > { %v329_v22 = vand.u32 2147483647, %v1678_v21  ;;  %v332_v23 = vand.u32 2139095040, %v1678_v21  ;;  %vm331_vm14 = vcmp.lt.s32.totalorder %v1678_v21, 0 }
  0xba   : > { %v319_v24 = vpop.permute.xlu0 %318 }
  0xbb   : > { %v333_v25 = vshrl.u32 %v332_v23, 23  ;;  %v1682_v26 = vmul.f32 %v1171_v19, %v319_v24  ;;  %v336_v27 = vand.u32 8388607, %v329_v22  ;;  %vm1736_vm15 = vcmp.le.f32.partialorder %v329_v22, 0.7853982 }
  0xbd   : > { %v1172_v28 = vadd.s32 4294967169, %v333_v25  ;;  %v435_v29 = vand.u32 2139095040, %v1682_v26  ;;  %v337_v31 = vor.u32 8388608, %v336_v27  ;;  %v432_v33 = vand.u32 2147483647, %v1682_v26 }
  0xbf   : > { %v339_v30 = vadd.s32 1, %v1172_v28  ;;  %v436_v32 = vshrl.u32 %v435_v29, 23  ;;  %v1688_v38 = vshll.u32 %v337_v31, 8  ;;  %v439_v42 = vand.u32 8388607, %v432_v33 }
  0xc1   : > { %vm340_vm0 = vcmp.gt.s32.totalorder %v339_v30, 0  ;;  %v1176_v35 = vadd.s32 4294967169, %v436_v32  ;;  %v440_v8 = vor.u32 8388608, %v439_v42 }
  0xc2   : > { %v341_v34 = vsel %vm340_vm0, %v339_v30, 0  ;;  %vm434_vm0 = vcmp.lt.s32.totalorder %v1682_v26, 0 }
  0xc3   : > { %v342_v36 = vshrl.u32 %v341_v34, 5  ;;  %v343_v37 = vand.u32 31, %v341_v34  ;;  %v442_v43 = vadd.s32 1, %v1176_v35  ;;  %v480_v23 = vshll.u32 %v440_v8, 8 }
  0xc5   : > { %v344_v39 = vsub.s32 32, %v343_v37  ;;  %v346_v41 = vshll.u32 %v1532_v40, %v343_v37  ;;  %v349_v45 = vshll.u32 %v1533_v44, %v343_v37  ;;  %v352_v47 = vshll.u32 %v1534_v46, %v343_v37 }
  0xc6   : > { %v355_v49 = vshll.u32 %v1535_v48, %v343_v37  ;;  %v358_v51 = vshll.u32 %v1536_v50, %v343_v37  ;;  %vm361_vm1 = vcmp.lt.s32.totalorder %v342_v36, 1  ;;  %vm363_vm2 = vcmp.lt.s32.totalorder %v342_v36, 3 }
  0xc7   : > { %v347_v52 = vshrl.u32 %v1533_v44, %v344_v39  ;;  %v350_v53 = vshrl.u32 %v1534_v46, %v344_v39  ;;  %v353_v54 = vshrl.u32 %v1535_v48, %v344_v39  ;;  %v345_v55 = vshrl.u32 %v1532_v40, %v344_v39 }
  0xc8   : > { %v356_v56 = vshrl.u32 %v1536_v50, %v344_v39  ;;  %v359_v58 = vshrl.u32 %v1537_v57, %v344_v39  ;;  %vm443_vm3 = vcmp.gt.s32.totalorder %v442_v43, 0  ;;  %vm364_vm4 = vcmp.lt.s32.totalorder %v342_v36, 4 }
  0xc9   : > { %v348_v59 = vor.u32 %v347_v52, %v346_v41  ;;  %v351_v60 = vor.u32 %v350_v53, %v349_v45  ;;  %v354_v61 = vor.u32 %v353_v54, %v352_v47  ;;  %v444_v0 = vsel %vm443_vm3, %v442_v43, 0 }
  0xca   : > { %v357_v62 = vor.u32 %v356_v56, %v355_v49  ;;  %v360_v63 = vor.u32 %v359_v58, %v358_v51  ;;  %vm362_vm5 = vcmp.lt.s32.totalorder %v342_v36, 2  ;;  %v446_v11 = vand.u32 31, %v444_v0 }
  0xcb   : > { %v365_v1 = vsel %vm361_vm1, %v345_v55, %v348_v59  ;;  %v366_v2 = vsel %vm364_vm4, %v354_v61, 2102212464  ;;  %v369_v3 = vsel %vm361_vm1, %v348_v59, %v351_v60  ;;  %v373_v4 = vsel %vm361_vm1, %v351_v60, %v354_v61 }
  0xcc   : > { %v367_v5 = vsel %vm363_vm2, %v351_v60, %v366_v2  ;;  %v370_v6 = vsel %vm364_vm4, %v357_v62, 920167782  ;;  %v374_v7 = vsel %vm364_vm4, %v360_v63, 1326507024  ;;  %v445_v19 = vshrl.u32 %v444_v0, 5 }
  0xcd   : > { %v371_v9 = vsel %vm363_vm2, %v354_v61, %v370_v6  ;;  %v375_v10 = vsel %vm363_vm2, %v357_v62, %v374_v7  ;;  %v368_v12 = vsel %vm362_vm5, %v365_v1, %v367_v5  ;;  %v447_v20 = vsub.s32 32, %v446_v11 }
  0xce   : > { %v372_v13 = vsel %vm362_vm5, %v369_v3, %v371_v9  ;;  %v376_v14 = vsel %vm362_vm5, %v373_v4, %v375_v10  ;;  %v384_v24 = vmul.u32 %v1688_v38, %v368_v12  ;;  %v449_v25 = vshll.u32 %v1532_v40, %v446_v11 }
  0xcf   : > { %v1701_v15 = vmul.u32.u64.low %v1688_v38, %v376_v14  ;;  %v1702_v16 = vmul.u32.u64.high %v1688_v38, %v376_v14, %v1701_v15  ;;  %v1705_v17 = vmul.u32.u64.low %v1688_v38, %v372_v13  ;;  %v1706_v18 = vmul.u32.u64.high %v1688_v38, %v372_v13, %v1705_v17 }
  0xd0   : > { %v452_v27 = vshll.u32 %v1533_v44, %v446_v11  ;;  %v455_v28 = vshll.u32 %v1534_v46, %v446_v11  ;;  %v450_v29 = vshrl.u32 %v1533_v44, %v447_v20  ;;  %v453_v30 = vshrl.u32 %v1534_v46, %v447_v20 }
  0xd1   : > { %v456_v31 = vshrl.u32 %v1535_v48, %v447_v20  ;;  %v458_v32 = vshll.u32 %v1535_v48, %v446_v11  ;;  %vm386_vm6 = vc.u32 %v1702_v16, %v1705_v17  ;;  %v387_v34 = vadd.s32 1, %v1706_v18 }
  0xd2   : > { %v459_v35 = vshrl.u32 %v1536_v50, %v447_v20  ;;  %v461_v36 = vshll.u32 %v1536_v50, %v446_v11  ;;  %v451_v37 = vor.u32 %v450_v29, %v449_v25  ;;  %v454_v39 = vor.u32 %v453_v30, %v452_v27 }
  0xd3   : > { %v457_v41 = vor.u32 %v456_v31, %v455_v28  ;;  %v462_v42 = vshrl.u32 %v1537_v57, %v447_v20  ;;  %v388_v38 = vsel %vm386_vm6, %v387_v34, %v1706_v18  ;;  %vm464_vm7 = vcmp.lt.s32.totalorder %v445_v19, 1 }
  0xd4   : > { %v460_v43 = vor.u32 %v459_v35, %v458_v32  ;;  %vm467_vm8 = vcmp.lt.s32.totalorder %v445_v19, 4  ;;  %v389_v44 = vadd.s32 %v388_v38, %v384_v24  ;;  %vm466_vm9 = vcmp.lt.s32.totalorder %v445_v19, 3 }
  0xd5   : > { %v463_v45 = vor.u32 %v462_v42, %v461_v36  ;;  %v469_v46 = vsel %vm467_vm8, %v457_v41, 2102212464  ;;  %v448_v47 = vshrl.u32 %v1532_v40, %v447_v20  ;;  %v472_v48 = vsel %vm464_vm7, %v451_v37, %v454_v39 }
  0xd6   : > { %v473_v49 = vsel %vm467_vm8, %v460_v43, 920167782  ;;  %v476_v51 = vsel %vm464_vm7, %v454_v39, %v457_v41  ;;  %v390_v52 = vadd.s32 536870912, %v389_v44  ;;  %vm465_vm10 = vcmp.lt.s32.totalorder %v445_v19, 2 }
  0xd7   : > { %v474_v50 = vsel %vm466_vm9, %v457_v41, %v473_v49  ;;  %v477_v53 = vsel %vm467_vm8, %v463_v45, 1326507024  ;;  %v468_v54 = vsel %vm464_vm7, %v448_v47, %v451_v37  ;;  %v470_v55 = vsel %vm466_vm9, %v454_v39, %v469_v46 }
  0xd8   : > { %v475_v56 = vsel %vm465_vm10, %v472_v48, %v474_v50  ;;  %v478_v57 = vsel %vm466_vm9, %v460_v43, %v477_v53  ;;  %v1716_v58 = vshrl.u32 %v390_v52, 30  ;;  %v471_v0 = vsel %vm465_vm10, %v468_v54, %v470_v55 }
  0xd9   : > { %v479_v59 = vsel %vm465_vm10, %v476_v51, %v478_v57  ;;  %v1718_v60 = vmul.u32.u64.low %v480_v23, %v475_v56  ;;  %v1719_v61 = vmul.u32.u64.high %v480_v23, %v475_v56, %v1718_v60  ;;  %v487_v3 = vmul.u32 %v480_v23, %v471_v0 }
  0xda   : > { %v1721_v62 = vmul.u32.u64.low %v480_v23, %v479_v59  ;;  %v1722_v63 = vmul.u32.u64.high %v480_v23, %v479_v59, %v1721_v62  ;;  %v392_v40 = vshll.u32 %v1716_v58, 30  ;;  %v385_v15 = vadd.s32 %v1705_v17, %v1702_v16 }
  0xdb   : > { %v490_v2 = vadd.s32 1, %v1719_v61  ;;  %v415_v53 = vsub.s32 4, %v1716_v58  ;;  %vm433_vm1 = vcmp.le.f32.partialorder %v432_v33, 0.7853982 }
  0xdc   : > { %v393_v1 = vsub.s32 %v389_v44, %v392_v40  ;;  %vm489_vm11 = vc.u32 %v1722_v63, %v1718_v60  ;;  %v488_v39 = vadd.s32 %v1718_v60, %v1722_v63 }
  0xdd   : > { %v491_v5 = vsel %vm489_vm11, %v490_v2, %v1719_v61  ;;  %v416_v56 = vsel %vm331_vm14, %v415_v53, %v1716_v58 }
  0xde   : > { %v395_v4 = vsub.s32 0, %v393_v1  ;;  %v492_v6 = vadd.s32 %v491_v5, %v487_v3  ;;  %v418_v59 = vsel %vm1736_vm15, 0, %v416_v56 }
  0xdf   : > { %v629_v62 = vadd.s32 3, %v418_v59 }
  0xe0   : > { %v1173_v7 = vmin.u32 %v395_v4, %v393_v1  ;;  %v493_v8 = vadd.s32 536870912, %v492_v6 }
  0xe1   : > { %v630_v2 = vand.u32 3, %v629_v62  ;;  %v1205_v62 = vld [vmem:[%s1826_s5] ss:$0 sm:$0xff] }
  0xe2   : > { %v397_v9 = vclz %v1173_v7  ;;  %v494_v10 = vshrl.u32 %v493_v8, 30 }
  0xe3   : > { %vm632_vm4 = vcmp.eq.s32.totalorder %v630_v2, 0  ;;  %vm635_vm5 = vcmp.eq.s32.totalorder %v630_v2, 2  ;;  %vm631_vm8 = vcmp.lt.s32.totalorder %v630_v2, 2 }
  0xe4   : > { %v1174_v11 = vadd.s32 4294967294, %v397_v9  ;;  %v495_v12 = vshll.u32 %v494_v10, 30  ;;  %v518_v55 = vsub.s32 4, %v494_v10 }
  0xe6   : > { %vm1175_vm12 = vcmp.lt.s32.totalorder %v1174_v11, 0  ;;  %v496_v14 = vsub.s32 %v492_v6, %v495_v12  ;;  %v519_v60 = vsel %vm434_vm0, %v518_v55, %v494_v10 }
  0xe7   : > { %v400_v13 = vsel %vm1175_vm12, 0, %v1174_v11  ;;  %v521_v61 = vsel %vm433_vm1, 0, %v519_v60 }
  0xe8   : > { %v401_v18 = vsub.s32 32, %v400_v13  ;;  %v405_v19 = vsub.s32 4294967266, %v400_v13  ;;  %v498_v20 = vsub.s32 0, %v496_v14  ;;  %v402_v23 = vshll.u32 %v393_v1, %v400_v13 }
  0xe9   : > { %v733_v0 = vadd.s32 3, %v521_v61  ;;  %v422_v1 = vand.u32 3, %v418_v59  ;;  %v525_v4 = vand.u32 3, %v521_v61 }
  0xea   : > { %v403_v24 = vshrl.u32 %v385_v15, %v401_v18  ;;  %v406_v25 = vadd.s32 127, %v405_v19  ;;  %v1177_v27 = vmin.u32 %v498_v20, %v496_v14 }
  0xeb   : > { %v734_v5 = vand.u32 3, %v733_v0  ;;  %vm424_vm2 = vcmp.eq.s32.totalorder %v422_v1, 0  ;;  %vm427_vm3 = vcmp.eq.s32.totalorder %v422_v1, 2  ;;  %vm423_vm6 = vcmp.lt.s32.totalorder %v422_v1, 2 }
  0xec   : > { %v404_v28 = vor.u32 %v403_v24, %v402_v23  ;;  %v407_v29 = vshll.u32 %v406_v25, 23  ;;  %v500_v30 = vclz %v1177_v27  ;;  %vm527_vm7 = vcmp.eq.s32.totalorder %v525_v4, 0 }
  0xed   : > { %vm530_vm9 = vcmp.eq.s32.totalorder %v525_v4, 2  ;;  %vm736_vm10 = vcmp.eq.s32.totalorder %v734_v5, 0  ;;  %vm739_vm11 = vcmp.eq.s32.totalorder %v734_v5, 2  ;;  %vm526_vm12 = vcmp.lt.s32.totalorder %v525_v4, 2 }
  0xee   : > { %v408_v31 = vor.u32 4788187, %v407_v29  ;;  %v1178_v32 = vadd.s32 4294967294, %v500_v30  ;;  %v411_v35 = vcvt.s32.f32 %v404_v28 }
  0xf0   : > { %v409_v34 = vand.u32 2147483647, %v408_v31  ;;  %vm1179_vm13 = vcmp.lt.s32.totalorder %v1178_v32, 0 }
  0xf1   : > { %v503_v37 = vsel %vm1179_vm13, 0, %v1178_v32  ;;  %vm735_vm13 = vcmp.lt.s32.totalorder %v734_v5, 2  ;;  %v1381_v32 = vld [vmem:[#allocation5 + $0x38] sm:$0xff]  }
  0xf2   : > { %v412_v36 = vmul.f32 %v411_v35, %v409_v34  ;;  %v504_v16 = vsub.s32 32, %v503_v37  ;;  %v508_v17 = vsub.s32 4294967266, %v503_v37  ;;  %v505_v42 = vshll.u32 %v496_v14, %v503_v37  ;;  %v1382_v35 = vld [vmem:[#allocation5 + $0x30] sm:$0xff]  }
  0xf3   : > { %v1538_v34 = vmov 0.0   ;;  %v1386_v37 = vld [vmem:[#allocation5 + $0x10] sm:$0xff]  }
  0xf4   : > { %v413_v41 = vxor.u32 2147483648, %v412_v36  ;;  %v506_v38 = vshrl.u32 %v488_v39, %v504_v16  ;;  %v509_v43 = vadd.s32 127, %v508_v17  ;;  %1264 = vmatprep.subr.bf16.mxu1 %v1538_v34  ;;  %v1387_v39 = vld [vmem:[#allocation5 + $0x8] sm:$0xff]   ;;  %v1388_v16 = vld [vmem:[#allocation5] sm:$0xff]  }
  0xf5   : > { %1265 = vmatpush3.bf16.msra.mxu1 %v1381_v32 }
  0xf6   : > { %v414_v44 = vsel %vm331_vm14, %v413_v41, %v412_v36  ;;  %v507_v45 = vor.u32 %v506_v38, %v505_v42  ;;  %v510_v46 = vshll.u32 %v509_v43, 23  ;;  %vm421_vm14 = vweird.f32 %v1678_v21  ;;  %1266 = vmatprep.subr.bf16.mxu1 %v1538_v34  ;;  %v1385_v36 = vld [vmem:[#allocation5 + $0x18] sm:$0xff]   ;;  %v1188_v41 = vld [vmem:[%s1824_s3] ss:$0 sm:$0xff] }
  0xf7   : > { %v417_v48 = vsel %vm1736_vm15, %v1678_v21, %v414_v44  ;;  %vm524_vm15 = vweird.f32 %v1682_v26  ;;  %v1383_v21 = vld [vmem:[#allocation5 + $0x28] sm:$0xff]  }
  0xf8   : > { %v511_v49 = vor.u32 4788187, %v510_v46  ;;  %v514_v52 = vcvt.s32.f32 %v507_v45  ;;  %1389 = vcosq.f32 %v417_v48 }
  0xf9   : > { %1391 = vsinq.f32 %v417_v48  ;;  %1267 = vmatpush3.bf16.msra.mxu1 %v1382_v35 }
  0xfa   : > { %v512_v51 = vand.u32 2147483647, %v511_v49  ;;  %1268 = vmatprep.subr.bf16.mxu1 %v1538_v34 }
  0xfc   : > { %v515_v50 = vmul.f32 %v514_v52, %v512_v51 }
  0xfd   : > { %1269 = vmatpush3.bf16.msra.mxu1 %v1383_v21 }
  0xfe   : > { %v516_v54 = vxor.u32 2147483648, %v515_v50  ;;  %1270 = vmatprep.subr.bf16.mxu1 %v1538_v34 }
 0x100   : > { %v517_v22 = vsel %vm434_vm0, %v516_v54, %v515_v50  ;;  %vm1539_vm0 = vmmov 0  }
 0x101   : > { %v520_v57 = vsel %vm433_vm1, %v1682_v26, %v517_v22  ;;  %v1384_v26 = vld [vmem:[#allocation5 + $0x20] sm:$0xff]   ;;  %1280 = vmatprep.mubr.msk.bf16.mxu1 %vm1539_vm0, %v1538_v34 }
 0x102   : > { %1393 = vcosq.f32 %v520_v57  ;;  %1271 = vmatpush3.bf16.msra.mxu1 %v1384_v26 }
 0x103   : > { %1395 = vsinq.f32 %v520_v57  ;;  %1272 = vmatprep.subr.bf16.mxu1 %v1538_v34 }
 0x105   : > { %v1390_v63 = vpop.eup %1389 }
 0x106   : > { %v1392_v40 = vpop.eup %1391  ;;  %v428_v58 = vxor.u32 2147483648, %v1390_v63  ;;  %1273 = vmatpush3.bf16.msra.mxu1 %v1385_v36 }
 0x107   : > { %v425_v3 = vxor.u32 2147483648, %v1392_v40  ;;  %1274 = vmatprep.subr.bf16.mxu1 %v1538_v34 }
 0x108   : > { %v429_v7 = vsel %vm427_vm3, %v428_v58, %v1392_v40  ;;  %v637_v9 = vsel %vm635_vm5, %v428_v58, %v1392_v40 }
 0x109   : > { %v426_v6 = vsel %vm424_vm2, %v1390_v63, %v425_v3  ;;  %v634_v8 = vsel %vm632_vm4, %v1390_v63, %v425_v3 }
 0x10a   : > { %v430_v13 = vsel %vm423_vm6, %v426_v6, %v429_v7  ;;  %v638_v15 = vsel %vm631_vm8, %v634_v8, %v637_v9  ;;  %1275 = vmatpush3.bf16.msra.mxu1 %v1386_v37 }
 0x10b   : > { %v431_v25 = vsel %vm421_vm14, nan, %v430_v13  ;;  %v639_v28 = vsel %vm421_vm14, nan, %v638_v15  ;;  %1276 = vmatprep.subr.bf16.mxu1 %v1538_v34 }
 0x10e   : > { %1277 = vmatpush3.bf16.msra.mxu1 %v1387_v39 }
 0x10f   : > { %v1394_v33 = vpop.eup %1393  ;;  %1278 = vmatprep.subr.bf16.mxu1 %v1538_v34 }
 0x110   : > { %v1396_v10 = vpop.eup %1395  ;;  %v531_v11 = vxor.u32 2147483648, %v1394_v33 }
 0x111   : > { %v528_v12 = vxor.u32 2147483648, %v1396_v10 }
 0x112   : > { %v532_v14 = vsel %vm530_vm9, %v531_v11, %v1396_v10  ;;  %v741_v18 = vsel %vm739_vm11, %v531_v11, %v1396_v10  ;;  %1279 = vmatpush3.bf16.msra.mxu1 %v1388_v16 }
 0x113   : > { %v529_v19 = vsel %vm527_vm7, %v1394_v33, %v528_v12  ;;  %v738_v20 = vsel %vm736_vm10, %v1394_v33, %v528_v12 }
 0x114   : > { %v533_v23 = vsel %vm526_vm12, %v529_v19, %v532_v14  ;;  %v742_v24 = vsel %vm735_vm13, %v738_v20, %v741_v18 }
 0x115   : > { %v534_v27 = vsel %vm524_vm15, nan, %v533_v23  ;;  %v743_v29 = vsel %vm524_vm15, nan, %v742_v24 }
 0x116   : > { %v744_v30 = vpack.c.bf16 %v743_v29, %v639_v28  ;;  %v535_v31 = vpack.c.bf16 %v534_v27, %v431_v25 }
 0x118   : > { %912 = vmatprep.mubr.bf16.mxu0 %v744_v30 }
 0x119   : > { %913 = vmatmul.mubr.bf16.vlgmr.msra.gmra.mxu0 %v535_v31 }
 0x1d9   : > { %v1249_v17 = vpop.f32.mrf.mxu0 }
 0x1db   : > { %v1250_v42 = vpop.f32.mrf.mxu0 }
 0x1dc   : > { %v1251_v38 = vadd.f32 %v1250_v42, %v1249_v17 }
 0x1dd   : > { %v1252_v43 = vpop.f32.mrf.mxu0 }
 0x1de   : > { %v915_v44 = vadd.f32 %v1251_v38, %v1188_v41 }
 0x1df   : > { %v1253_v45 = vpop.f32.mrf.mxu0 }
 0x1e0   : > { %v921_v46 = vsub.f32 0.0, %v915_v44  ;;  %v1254_v47 = vadd.f32 %v1253_v45, %v1252_v43 }
 0x1e2   : > { %v923_v48 = vmul.f32 1.442695, %v921_v46  ;;  %v918_v49 = vadd.f32 %v1254_v47, %v1188_v41 }
 0x1e4   : > { %1397 = vpow2.f32 %v923_v48  ;;  %v922_v51 = vsub.f32 0.0, %v918_v49 }
 0x1e6   : > { %v925_v52 = vmul.f32 1.442695, %v922_v51 }
 0x1e8   : > { %1399 = vpow2.f32 %v925_v52 }
 0x1f1   : > { %v1398_v50 = vpop.eup %1397 }
 0x1f2   : > { %v927_v53 = vadd.f32 1.0, %v1398_v50 }
 0x1f4   : > { %1401 = vrcp.f32 %v927_v53 }
 0x1f5   : > { %v1400_v54 = vpop.eup %1399 }
 0x1f6   : > { %v928_v55 = vadd.f32 1.0, %v1400_v54 }
 0x1f8   : > { %1403 = vrcp.f32 %v928_v55 }
 0x201   : > { %v1402_v22 = vpop.eup %1401 }
 0x202   : > { %v931_v57 = vmul.f32 %v1402_v22, %v915_v44 }
 0x205   : > { %v1404_v56 = vpop.eup %1403 }
 0x206   : > { %v932_v59 = vmul.f32 %v1404_v56, %v918_v49 }
 0x208   : > { %v933_v60 = vpack.c.bf16 %v932_v59, %v931_v57 }
 0x20a   : > { %1281 = vmatmul.mubr.bf16.vlgmr.msra.gmra.mxu1 %v933_v60 }
 0x2ca   : > { %v1039_v61 = vpop.f32.mrf.mxu1 }
 0x2cb   : > { %v1040_v0 = vadd.f32 %v1205_v62, %v1039_v61 }
 0x2cc   : > { %v1282_v63 = vpop.f32.mrf.mxu1 }
 0x2ce   : > { %v1042_v40 = vpop.f32.mrf.mxu1 }
 0x2cf   : > { %v1043_v1 = vadd.f32 %v1205_v62, %v1042_v40  ;;  %1063 = sbr.rel (!%p1616_p5) target bundleno = 751 (0x2ef), region = 56 }
 0x2d0   : > { %v1283_v2 = vpop.f32.mrf.mxu1 }
 0x2d1   : > { %v1231_v3 = vpack.c.bf16 %v1043_v1, %v1040_v0 }
 0x2d3   : > { %1232 = vst [vmem:[%s287_s28] sm:$0xff] %v1231_v3  }
 0x2d4   : > { %s1845_s10 = smov (!%p1066_p10, %s1065_s10), 2 }
 0x2d5   : > { %s1767_s11 = sshll.u32 %s1845_s10, 6 }
 0x2d6   : > { %s1070_s12 = ssub.s32 128, %s1767_s11 }
 0x2d7   : > { %1071 = vsyncadd %s1762_s9, %s1070_s12  ;;  %p1219_p12 = scmp.ne.s32.totalorder %s1767_s11, 0  ;;  %s1227_s13 = sshll.u32 %s1599_s25, 7 }
 0x2d8   : > { %s1776_s7 = scalar_lea.hbm %s1827_s6, %s1227_s13  ;;  %s1076_s16 = sshll.u32 %s287_s28, 4  ;;  %s1778_s16 = int_to_ptr.vmem [resolvable:$true] %s1076_s16 }
 0x2d9   : > { %s1457_s29 = scalar_lea.vmem %s1778_s16, %s1767_s11  ;;  %s1540_s17 = smov [#allocation7]  }
 0x2da   : > { %p1458_p5 = scmp.ne.s32.totalorder %s1778_s16, %s1457_s29  ;;  %s1461_s18 = sshll.u32 %s1540_s17, 4  ;;  %s1462_s18 = int_to_ptr.vmem [resolvable:$false] %s1461_s18 }
 0x2db   : > { %s1463_s25 = scalar_lea.vmem %s1462_s18, 256  ;;  %p1464_p0 = scmp.lt.s32.totalorder %s1778_s16, %s1462_s18 }
 0x2dc   : > { %p1459_p8 = pnand %p1458_p5, %p1219_p12  ;;  %p1465_p1 = scmp.lt.s32.totalorder %s1463_s25, %s1457_s29 }
 0x2de   : > { %p1460_p11 = pneg %p1459_p8  ;;  %p1466_p3 = por %p1465_p1, %p1464_p0 }
 0x2e0   : > { %p1467_p2 = pnand %p1466_p3, %p1460_p11 }
 0x2e2   : > { %1470 = shalt.err (!%p1467_p2)
}
 0x2e3   : > { %s1471_s19 = scalar_lea.hbm %s1776_s7, %s1767_s11  ;;  %s1475_s28 = scalar_lea.hbm %s1827_s6, 192 }
 0x2e4   : > { %p1472_p4 = scmp.ne.s32.totalorder %s1776_s7, %s1471_s19  ;;  %p1476_p6 = scmp.lt.s32.totalorder %s1776_s7, %s1827_s6 }
 0x2e5   : > { %p1477_p9 = scmp.lt.s32.totalorder %s1475_s28, %s1471_s19 }
 0x2e6   : > { %p1473_p13 = pnand %p1472_p4, %p1219_p12 }
 0x2e7   : > { %p1478_p10 = por %p1477_p9, %p1476_p6 }
 0x2e8   : > { %p1474_p7 = pneg %p1473_p13 }
 0x2ea   : > { %p1479_p5 = pnand %p1478_p10, %p1474_p7 }
 0x2ec   : > { %1482 = shalt.err (!%p1479_p5)
}
 0x2ed   : > { %s1541_s13 = smov 64   ;;  %s1542_s14 = smov 4  }
 0x2ee   : > { %1082 = dma.vmem_to_hbm [thread:$0]  (%p1219_p12), %s1778_s16, %s1767_s11, %s1776_s7, %s1762_s9, %s1541_s13, %s1541_s13, %s1542_s14  }
 0x2ef PF: > { %p1316_p8 = scmp.ge.s32.totalorder %s1525_s24, 2  ;;  %s1091_s15 = sand.u32 1, %s1513_s21  }
 0x2f0   : > { %p1839_p11 = scmp.ne.s32.totalorder %s1830_s8, 0  ;;  %s1092_s29 = scalar_lea.sflag [#allocation4], %s1091_s15 }
 0x2f2   : > { %p1309_p0 = pnand %p1316_p8, %p1839_p11 }
 0x2f4   : > { %p1310_p1 = pneg %p1309_p0 }
 0x2f6   : > { %1508 = dma.done.wait (%p1310_p1), %s1092_s29, 128  }
 0x2f7   : > { %1510 = vsyncadd (%p1310_p1), %s1092_s29, 4294967168  ;;  %p18_p3 = scmp.ge.s32.totalorder %s1603_s27, 4   ;;  %s1840_s21 = smov %s1517_s22 }
 0x2f8   : > { %s1841_s22 = smov %s1521_s23  ;;  %s1842_s23 = smov %s1614_s30 }
 0x2f9   : > { %s1843_s24 = smov %s1603_s27  ;;  %20 = sbr.rel (!%p18_p3) target bundleno = 5 (0x5), region = 88 }
 0x2fe   :  { %1097 = vsyncpa [#allocation3], 1 }
 0x2ff   :  { %1099 = vsyncpa [#allocation3 + $0x1], 1 }
 0x300   :  { %1100 = vsyncpa [#allocation6], 1 }
 0x301   :  { %1101 = vsyncpa [#allocation4], 1 }
 0x302   :  { %1103 = vsyncpa [#allocation4 + $0x1], 1 }

</bundles_post_ra>
